<compile_context>
chip_gen: v6e
topology: v6e:2x2x1
jax: 0.10.0
libtpu: 0.0.40
codegen_flags: <defaults>
</compile_context>

<pallas_src>
import math

import jax
import jax.numpy as jnp
from jax.experimental import pallas as pl
from jax.experimental.pallas import tpu as pltpu

D_IN = 784
D_H1 = 256
D_H2 = 128
D_OUT = 10
D_OUT_PAD = 128          # lane-dense padded output width (multiple of 128)
TB_MAX = 256             # batch tile: multiple of 128 (v5e MXU) and 256 (v6e/v7x MXU)


def _round_up(x, m):
    return (x + m - 1) // m * m


def _mlp_kernel(x_ref, w1_ref, b1_ref, w2_ref, b2_ref, w3_ref, b3_ref, o_ref):
    # Layer 1: (TB, 784) @ (784, 256), bf16 MXU inputs, f32 accumulation.
    x = x_ref[...].astype(jnp.bfloat16)
    h1 = jnp.dot(x, w1_ref[...], preferred_element_type=jnp.float32)
    h1 = jnp.maximum(h1 + b1_ref[...], 0.0)           # f32 epilogue (VPU)
    # Layer 2: (TB, 256) @ (256, 128)
    h2 = jnp.dot(h1.astype(jnp.bfloat16), w2_ref[...],
                 preferred_element_type=jnp.float32)
    h2 = jnp.maximum(h2 + b2_ref[...], 0.0)
    # Layer 3: (TB, 128) @ (128, 128); output cols >= 10 are exactly zero.
    out = jnp.dot(h2.astype(jnp.bfloat16), w3_ref[...],
                  preferred_element_type=jnp.float32)
    o_ref[...] = (out + b3_ref[...]).astype(o_ref.dtype)


def prepare_params(params):
    """One-time conversion to the kernel's resident layout:
    bf16 weights (in, out), f32 biases, layer-3 padded to 128 output lanes."""
    return {
        "w1": params["w1"].astype(jnp.bfloat16),
        "b1": params["b1"].astype(jnp.float32),
        "w2": params["w2"].astype(jnp.bfloat16),
        "b2": params["b2"].astype(jnp.float32),
        "w3": jnp.pad(params["w3"].astype(jnp.bfloat16),
                      ((0, 0), (0, D_OUT_PAD - D_OUT))),
        "b3": jnp.pad(params["b3"].astype(jnp.float32),
                      ((0, 0), (0, D_OUT_PAD - D_OUT))),
    }


def neural_network_forward(x, prepared):
    """Forward pass of the 784-256-128-10 MLP.

    x: (B, 1, 28, 28) (NCHW), or any (B, ...) with prod(...) == 784.
    prepared: output of prepare_params().
    Returns (B, 10) float32 logits.
    """
    b = x.shape[0]
    x_flat = x.reshape(b, -1).astype(jnp.float32)     # torch.flatten(x, 1)
    assert x_flat.shape[1] == D_IN

    # Batch tile: adaptive for small B (single grid step, minimal padding),
    # 256 (128- and 256-aligned) for large B.
    tb = min(TB_MAX, _round_up(b, 8))
    b_pad = _round_up(b, tb)
    if b_pad != b:
        x_flat = jnp.pad(x_flat, ((0, b_pad - b), (0, 0)))

    w1, b1 = prepared["w1"], prepared["b1"]
    w2, b2 = prepared["w2"], prepared["b2"]
    w3, b3 = prepared["w3"], prepared["b3"]

    # Constant index_map -> weight/bias blocks stay resident in VMEM across
    # grid steps (no re-DMA when the block index is unchanged).
    def const(shape):
        return pl.BlockSpec(shape, lambda i: (0, 0))

    flops = 2 * b_pad * (D_IN * D_H1 + D_H1 * D_H2 + D_H2 * D_OUT_PAD)
    bytes_accessed = (
        2 * (w1.size + w2.size + w3.size)             # bf16 weights
        + 4 * (b1.size + b2.size + b3.size)           # f32 biases
        + 4 * b_pad * D_IN                            # x in (f32)
        + 4 * b_pad * D_OUT_PAD                       # logits out (f32)
    )

    out = pl.pallas_call(
        _mlp_kernel,
        out_shape=jax.ShapeDtypeStruct((b_pad, D_OUT_PAD), jnp.float32),
        grid=(b_pad // tb,),
        in_specs=[
            pl.BlockSpec((tb, D_IN), lambda i: (i, 0)),   # x: batch-tiled
            const((D_IN, D_H1)), const((1, D_H1)),
            const((D_H1, D_H2)), const((1, D_H2)),
            const((D_H2, D_OUT_PAD)), const((1, D_OUT_PAD)),
        ],
        out_specs=pl.BlockSpec((tb, D_OUT_PAD), lambda i: (i, 0)),
        compiler_params=pltpu.CompilerParams(
            dimension_semantics=("parallel",),        # shards batch over v7x's 2 TCs
            vmem_limit_bytes=32 * 1024 * 1024,        # safe on v5e/v6e/v7x (~5 MiB used)
        ),
        cost_estimate=pl.CostEstimate(
            flops=flops, transcendentals=0, bytes_accessed=bytes_accessed),
    )(x_flat, w1, b1, w2, b2, w3, b3)

    return out[:b, :D_OUT]


def init_params(key):
    """Deterministic init mirroring PyTorch nn.Linear defaults
    (uniform(-1/sqrt(fan_in), 1/sqrt(fan_in)) for both weight and bias),
    stored as f32 in (in, out) layout."""
    dims = [(D_IN, D_H1), (D_H1, D_H2), (D_H2, D_OUT)]
    params = {}
    keys = jax.random.split(key, 2 * len(dims))
    for i, (fan_in, fan_out) in enumerate(dims):
        bound = 1.0 / math.sqrt(fan_in)
        params[f"w{i + 1}"] = jax.random.uniform(
            keys[2 * i], (fan_in, fan_out),
            minval=-bound, maxval=bound, dtype=jnp.float32)
        params[f"b{i + 1}"] = jax.random.uniform(
            keys[2 * i + 1], (1, fan_out),
            minval=-bound, maxval=bound, dtype=jnp.float32)
    return params


if __name__ == "__main__":
    key = jax.random.PRNGKey(0)
    k_param, k_x = jax.random.split(key)

    params = init_params(k_param)
    prepared = prepare_params(params)

    # Small MNIST-like batch: NCHW (8, 1, 28, 28) -> flatten -> 784 features.
    x = jax.random.normal(k_x, (8, 1, 28, 28), dtype=jnp.float32)

    # jit fuses the flatten / pad / slice plumbing around the pallas_call.
    forward = jax.jit(neural_network_forward)
    logits = forward(x, prepared)
    jax.block_until_ready(logits)
    assert logits.shape == (8, 10)

    # Pure-JAX reference with the SAME bf16 weight/activation casts and f32
    # accumulation (the kernel's numerics), so the comparison is tight.
    xf = x.reshape(x.shape[0], -1)
    w1b = params["w1"].astype(jnp.bfloat16)
    w2b = params["w2"].astype(jnp.bfloat16)
    w3b = params["w3"].astype(jnp.bfloat16)
    h = jnp.maximum(
        jnp.dot(xf.astype(jnp.bfloat16), w1b,
                preferred_element_type=jnp.float32) + params["b1"], 0.0)
    h = jnp.maximum(
        jnp.dot(h.astype(jnp.bfloat16), w2b,
                preferred_element_type=jnp.float32) + params["b2"], 0.0)
    ref = jnp.dot(h.astype(jnp.bfloat16), w3b,
                  preferred_element_type=jnp.float32) + params["b3"]

    assert jnp.allclose(logits, ref, atol=1e-3, rtol=1e-3), (
        float(jnp.max(jnp.abs(logits - ref))))

    print("KERNEL_OK")
</pallas_src>

<mosaic_0001>
module attributes {stable_mosaic.version = 11 : i64} {
  func.func @_mlp_kernel(%arg0: i32, %arg1: memref<8x784xf32, #tpu.memory_space<vmem>>, %arg2: memref<784x256xbf16, #tpu.memory_space<vmem>>, %arg3: memref<1x256xf32, #tpu.memory_space<vmem>>, %arg4: memref<256x128xbf16, #tpu.memory_space<vmem>>, %arg5: memref<1x128xf32, #tpu.memory_space<vmem>>, %arg6: memref<128x128xbf16, #tpu.memory_space<vmem>>, %arg7: memref<1x128xf32, #tpu.memory_space<vmem>>, %arg8: memref<8x128xf32, #tpu.memory_space<vmem>>) attributes {dimension_semantics = [#tpu.dimension_semantics<parallel>], iteration_bounds = array<i64: 1>, scalar_prefetch = 0 : i64, scratch_operands = 0 : i64, tpu.core_type = #tpu.core_type<tc>, window_params = [{transform_indices = @transform_0, window_bounds = array<i64: 8, 784>}, {pipeline_mode = #tpu.pipeline_mode<synchronous>, transform_indices = @transform_1, window_bounds = array<i64: 784, 256>}, {pipeline_mode = #tpu.pipeline_mode<synchronous>, transform_indices = @transform_2, window_bounds = array<i64: 1, 256>}, {pipeline_mode = #tpu.pipeline_mode<synchronous>, transform_indices = @transform_3, window_bounds = array<i64: 256, 128>}, {pipeline_mode = #tpu.pipeline_mode<synchronous>, transform_indices = @transform_4, window_bounds = array<i64: 1, 128>}, {pipeline_mode = #tpu.pipeline_mode<synchronous>, transform_indices = @transform_5, window_bounds = array<i64: 128, 128>}, {pipeline_mode = #tpu.pipeline_mode<synchronous>, transform_indices = @transform_6, window_bounds = array<i64: 1, 128>}, {transform_indices = @transform_7, window_bounds = array<i64: 8, 128>}]} {
    %c0 = arith.constant 0 : index
    %c0_0 = arith.constant 0 : index
    %0 = vector.load %arg1[%c0, %c0_0] : memref<8x784xf32, #tpu.memory_space<vmem>>, vector<8x784xf32>
    %1 = arith.truncf %0 : vector<8x784xf32> to vector<8x784xbf16>
    %c0_1 = arith.constant 0 : index
    %c0_2 = arith.constant 0 : index
    %2 = vector.load %arg2[%c0_1, %c0_2] : memref<784x256xbf16, #tpu.memory_space<vmem>>, vector<784x256xbf16>
    %cst = arith.constant dense<0.000000e+00> : vector<8x256xf32>
    %3 = tpu.matmul %1, %2, %cst {dimension_numbers = #tpu.dot_dimension_numbers<[1], [0], [0], [1], [0, 0, 1, 1], [], []>} : vector<8x784xbf16>, vector<784x256xbf16>, vector<8x256xf32> -> vector<8x256xf32>
    %c0_3 = arith.constant 0 : index
    %c0_4 = arith.constant 0 : index
    %4 = vector.load %arg3[%c0_3, %c0_4] : memref<1x256xf32, #tpu.memory_space<vmem>>, vector<1x256xf32>
    %5 = vector.broadcast %4 : vector<1x256xf32> to vector<8x256xf32>
    %6 = arith.addf %3, %5 : vector<8x256xf32>
    %cst_5 = arith.constant 0.000000e+00 : f32
    %7 = vector.broadcast %cst_5 : f32 to vector<8x256xf32>
    %8 = arith.maximumf %6, %7 : vector<8x256xf32>
    %9 = arith.truncf %8 : vector<8x256xf32> to vector<8x256xbf16>
    %c0_6 = arith.constant 0 : index
    %c0_7 = arith.constant 0 : index
    %10 = vector.load %arg4[%c0_6, %c0_7] : memref<256x128xbf16, #tpu.memory_space<vmem>>, vector<256x128xbf16>
    %cst_8 = arith.constant dense<0.000000e+00> : vector<8x128xf32>
    %11 = tpu.matmul %9, %10, %cst_8 {dimension_numbers = #tpu.dot_dimension_numbers<[1], [0], [0], [1], [0, 0, 1, 1], [], []>} : vector<8x256xbf16>, vector<256x128xbf16>, vector<8x128xf32> -> vector<8x128xf32>
    %c0_9 = arith.constant 0 : index
    %c0_10 = arith.constant 0 : index
    %12 = vector.load %arg5[%c0_9, %c0_10] : memref<1x128xf32, #tpu.memory_space<vmem>>, vector<1x128xf32>
    %13 = vector.broadcast %12 : vector<1x128xf32> to vector<8x128xf32>
    %14 = arith.addf %11, %13 : vector<8x128xf32>
    %cst_11 = arith.constant 0.000000e+00 : f32
    %15 = vector.broadcast %cst_11 : f32 to vector<8x128xf32>
    %16 = arith.maximumf %14, %15 : vector<8x128xf32>
    %17 = arith.truncf %16 : vector<8x128xf32> to vector<8x128xbf16>
    %c0_12 = arith.constant 0 : index
    %c0_13 = arith.constant 0 : index
    %18 = vector.load %arg6[%c0_12, %c0_13] : memref<128x128xbf16, #tpu.memory_space<vmem>>, vector<128x128xbf16>
    %cst_14 = arith.constant dense<0.000000e+00> : vector<8x128xf32>
    %19 = tpu.matmul %17, %18, %cst_14 {dimension_numbers = #tpu.dot_dimension_numbers<[1], [0], [0], [1], [0, 0, 1, 1], [], []>} : vector<8x128xbf16>, vector<128x128xbf16>, vector<8x128xf32> -> vector<8x128xf32>
    %c0_15 = arith.constant 0 : index
    %c0_16 = arith.constant 0 : index
    %20 = vector.load %arg7[%c0_15, %c0_16] : memref<1x128xf32, #tpu.memory_space<vmem>>, vector<1x128xf32>
    %21 = vector.broadcast %20 : vector<1x128xf32> to vector<8x128xf32>
    %22 = arith.addf %19, %21 : vector<8x128xf32>
    %c0_17 = arith.constant 0 : index
    %c0_18 = arith.constant 0 : index
    %23 = vector.load %arg8[%c0_17, %c0_18] : memref<8x128xf32, #tpu.memory_space<vmem>>, vector<8x128xf32>
    tpu.vector_store %arg8[%c0_17, %c0_18], %22 {strides = array<i32>} : memref<8x128xf32, #tpu.memory_space<vmem>>, vector<8x128xf32>,
    return
  }
  func.func @transform_0(%arg0: i32) -> (i32, i32) {
    %c0_i32 = arith.constant 0 : i32
    %c0_i32_0 = arith.constant 0 : i32
    return %arg0, %c0_i32 : i32, i32
  }
  func.func @transform_1(%arg0: i32) -> (i32, i32) {
    %c0_i32 = arith.constant 0 : i32
    %c0_i32_0 = arith.constant 0 : i32
    %c0_i32_1 = arith.constant 0 : i32
    return %c0_i32, %c0_i32_0 : i32, i32
  }
  func.func @transform_2(%arg0: i32) -> (i32, i32) {
    %c0_i32 = arith.constant 0 : i32
    %c0_i32_0 = arith.constant 0 : i32
    %c0_i32_1 = arith.constant 0 : i32
    return %c0_i32, %c0_i32_0 : i32, i32
  }
  func.func @transform_3(%arg0: i32) -> (i32, i32) {
    %c0_i32 = arith.constant 0 : i32
    %c0_i32_0 = arith.constant 0 : i32
    %c0_i32_1 = arith.constant 0 : i32
    return %c0_i32, %c0_i32_0 : i32, i32
  }
  func.func @transform_4(%arg0: i32) -> (i32, i32) {
    %c0_i32 = arith.constant 0 : i32
    %c0_i32_0 = arith.constant 0 : i32
    %c0_i32_1 = arith.constant 0 : i32
    return %c0_i32, %c0_i32_0 : i32, i32
  }
  func.func @transform_5(%arg0: i32) -> (i32, i32) {
    %c0_i32 = arith.constant 0 : i32
    %c0_i32_0 = arith.constant 0 : i32
    %c0_i32_1 = arith.constant 0 : i32
    return %c0_i32, %c0_i32_0 : i32, i32
  }
  func.func @transform_6(%arg0: i32) -> (i32, i32) {
    %c0_i32 = arith.constant 0 : i32
    %c0_i32_0 = arith.constant 0 : i32
    %c0_i32_1 = arith.constant 0 : i32
    return %c0_i32, %c0_i32_0 : i32, i32
  }
  func.func @transform_7(%arg0: i32) -> (i32, i32) {
    %c0_i32 = arith.constant 0 : i32
    %c0_i32_0 = arith.constant 0 : i32
    return %arg0, %c0_i32 : i32, i32
  }
}

</mosaic_0001>

<bundles_post_ra>
// kernel: neural_network_forward.1
= control target key start
LH: loop header
LB: loop body
LE: loop exit
PB: predicated region body
PF: predicated region fallthrough
CT: control target
= control target key end

     0   :  { %12 = vsyncpa [#allocation3], 0  ;;  %s1959_s0 = inlined_call_operand.vmem [shape: f32[8,784], index: 0, kind: input, shape index: {}]   ;;  %s1960_s1 = inlined_call_operand.vmem [shape: bf16[784,256], index: 1, kind: input, shape index: {}]   ;;  %s1961_s2 = inlined_call_operand.vmem [shape: f32[1,256], index: 2, kind: input, shape index: {}]   ;;  %s1962_s3 = inlined_call_operand.hbm [shape: bf16[256,128], index: 3, kind: input, shape index: {}]   ;;  %s1963_s4 = inlined_call_operand.vmem [shape: f32[1,128], index: 4, kind: input, shape index: {}]   ;;  %s1964_s5 = inlined_call_operand.hbm [shape: bf16[128,128], index: 5, kind: input, shape index: {}]   ;;  %s1965_s6 = inlined_call_operand.vmem [shape: f32[1,128], index: 6, kind: input, shape index: {}]   ;;  %s1966_s7 = inlined_call_operand.hbm [shape: f32[8,128], index: 7, kind: output, shape index: {}]  }
   0x1   :  { %13 = vsyncpa [#allocation6], 0 }
   0x2   :  { %14 = vsyncpa [#allocation4], 0  ;;  %s1568_s24 = smov [#allocation2]  }
   0x3   :  { %s26_s25 = sshll.u32 %s1568_s24, 4  ;;  %s27_s25 = int_to_ptr.vmem [resolvable:$true] %s26_s25 }
   0x4   :  { %s1510_s26 = scalar_lea.vmem %s27_s25, 2048  ;;  %p1515_p1 = scmp.lt.s32.totalorder %s27_s25, %s27_s25 }
   0x5   :  { %p1511_p0 = scmp.ne.s32.totalorder %s27_s25, %s1510_s26  ;;  %p1516_p2 = scmp.lt.s32.totalorder %s1510_s26, %s1510_s26 }
   0x7   :  { %p1517_p3 = por %p1516_p2, %p1515_p1 }
   0x9   :  { %p1518_p4 = pnand %p1517_p3, %p1511_p0 }
   0xb   :  { %1521 = shalt.err (!%p1518_p4)
}
   0xc   :  { %s1569_s27 = smov 64   ;;  %s1570_s28 = smov 4  }
   0xd   :  { %32 = dma.hbm_to_vmem [thread:$0]  %s1962_s3, 2048, %s27_s25, [#allocation3], %s1569_s27, %s1569_s27, %s1570_s28  }
   0xe   :  { %s1571_s8 = smov [#allocation5]  }
   0xf   :  { %s40_s9 = sshll.u32 %s1571_s8, 4  ;;  %s41_s9 = int_to_ptr.vmem [resolvable:$true] %s40_s9 }
  0x10   :  { %s1530_s10 = scalar_lea.vmem %s41_s9, 1024  ;;  %p1535_p6 = scmp.lt.s32.totalorder %s41_s9, %s41_s9 }
  0x11   :  { %p1531_p5 = scmp.ne.s32.totalorder %s41_s9, %s1530_s10  ;;  %p1536_p7 = scmp.lt.s32.totalorder %s1530_s10, %s1530_s10 }
  0x13   :  { %p1537_p8 = por %p1536_p7, %p1535_p6 }
  0x15   :  { %p1538_p9 = pnand %p1537_p8, %p1531_p5 }
  0x17   :  { %1541 = shalt.err (!%p1538_p9)
}
  0x18   :  { %46 = dma.hbm_to_vmem [thread:$0]  %s1964_s5, 1024, %s41_s9, [#allocation6], %s1569_s27, %s1569_s27, %s1570_s28  }
  0x19   :  { %1562 = dma.done.wait [#allocation3], 2048  }
  0x1a   :  { %1563 = vsyncadd [#allocation3], 4294965248 }
  0x1b   :  { %1564 = dma.done.wait [#allocation6], 1024  }
  0x1c   :  { %1565 = vsyncadd [#allocation6], 4294966272  ;;  %v1331_v0 = vld [vmem:[%s1960_s1 + $0x74] ss:$8 sps:$4 sm:$0xff]   ;;  %v1333_v1 = vld [vmem:[%s1960_s1 + $0x70] ss:$8 sps:$4 sm:$0xff]  }
  0x1d   :  { %674 = vmatprep.subr.bf16.mxu0 %v1331_v0  ;;  %v1334_v2 = vld [vmem:[%s1960_s1 + $0x174] ss:$8 sps:$4 sm:$0xff]   ;;  %v1336_v3 = vld [vmem:[%s1960_s1 + $0x170] ss:$8 sps:$4 sm:$0xff]   ;;  %v1337_v4 = vld [vmem:[%s1960_s1 + $0x64] ss:$8 sps:$4 sm:$0xff]  }
  0x1e   :  { %675 = vmatpush1.bf16.msra.mxu0 %v1333_v1  ;;  %v1339_v5 = vld [vmem:[%s1960_s1 + $0x60] ss:$8 sps:$4 sm:$0xff]   ;;  %715 = vmatprep.subr.bf16.mxu1 %v1334_v2  ;;  %v1340_v6 = vld [vmem:[%s1960_s1 + $0x164] ss:$8 sps:$4 sm:$0xff]   ;;  %v1343_v8 = vld [vmem:[%s1960_s1 + $0x54] ss:$8 sps:$4 sm:$0xff]  }
  0x1f   :  { %716 = vmatpush1.bf16.msra.mxu1 %v1336_v3  ;;  %676 = vmatprep.subr.bf16.mxu0 %v1337_v4  ;;  %v1342_v7 = vld [vmem:[%s1960_s1 + $0x160] ss:$8 sps:$4 sm:$0xff]   ;;  %v1345_v9 = vld [vmem:[%s1960_s1 + $0x50] ss:$8 sps:$4 sm:$0xff]   ;;  %v1346_v10 = vld [vmem:[%s1960_s1 + $0x154] ss:$8 sps:$4 sm:$0xff]  }
  0x20   :  { %717 = vmatprep.subr.bf16.mxu1 %v1340_v6  ;;  %v1349_v11 = vld [vmem:[%s1960_s1 + $0x44] ss:$8 sps:$4 sm:$0xff]   ;;  %v1348_v12 = vld [vmem:[%s1960_s1 + $0x150] ss:$8 sps:$4 sm:$0xff]   ;;  %v1351_v14 = vld [vmem:[%s1960_s1 + $0x40] ss:$8 sps:$4 sm:$0xff]  }
  0x21   :  { %v1352_v13 = vld [vmem:[%s1960_s1 + $0x144] ss:$8 sps:$4 sm:$0xff]   ;;  %v1355_v15 = vld [vmem:[%s1960_s1 + $0x34] ss:$8 sps:$4 sm:$0xff]   ;;  %v1354_v16 = vld [vmem:[%s1960_s1 + $0x140] ss:$8 sps:$4 sm:$0xff]  }
  0x22   :  { %677 = vmatpush1.bf16.msra.mxu0 %v1339_v5  ;;  %v1358_v17 = vld [vmem:[%s1960_s1 + $0x134] ss:$8 sps:$4 sm:$0xff]   ;;  %v1357_v18 = vld [vmem:[%s1960_s1 + $0x30] ss:$8 sps:$4 sm:$0xff]   ;;  %v1361_v19 = vld [vmem:[%s1960_s1 + $0x24] ss:$8 sps:$4 sm:$0xff]  }
  0x23   :  { %678 = vmatprep.subr.bf16.mxu0 %v1343_v8  ;;  %718 = vmatpush1.bf16.msra.mxu1 %v1342_v7  ;;  %v1360_v20 = vld [vmem:[%s1960_s1 + $0x130] ss:$8 sps:$4 sm:$0xff]   ;;  %v1364_v21 = vld [vmem:[%s1960_s1 + $0x124] ss:$8 sps:$4 sm:$0xff]   ;;  %v1363_v22 = vld [vmem:[%s1960_s1 + $0x20] ss:$8 sps:$4 sm:$0xff]  }
  0x24   :  { %719 = vmatprep.subr.bf16.mxu1 %v1346_v10  ;;  %v1367_v23 = vld [vmem:[%s1960_s1 + $0x14] ss:$8 sps:$4 sm:$0xff]   ;;  %v1366_v24 = vld [vmem:[%s1960_s1 + $0x120] ss:$8 sps:$4 sm:$0xff]   ;;  %v1369_v26 = vld [vmem:[%s1960_s1 + $0x10] ss:$8 sps:$4 sm:$0xff]  }
  0x25   :  { %v1370_v25 = vld [vmem:[%s1960_s1 + $0x114] ss:$8 sps:$4 sm:$0xff]   ;;  %v1373_v27 = vld [vmem:[%s1960_s1 + $0x4] ss:$8 sps:$4 sm:$0xff]   ;;  %v1372_v28 = vld [vmem:[%s1960_s1 + $0x110] ss:$8 sps:$4 sm:$0xff]  }
  0x26   :  { %679 = vmatpush1.bf16.msra.mxu0 %v1345_v9  ;;  %v1376_v29 = vld [vmem:[%s1960_s1 + $0x104] ss:$8 sps:$4 sm:$0xff]   ;;  %v1375_v30 = vld [vmem:[%s1960_s1] ss:$8 sps:$4 sm:$0xff]   ;;  %v1379_v31 = vld [vmem:[%s1960_s1 + $0xf4] ss:$8 sps:$4 sm:$0xff]  }
  0x27   :  { %680 = vmatprep.subr.bf16.mxu0 %v1349_v11  ;;  %720 = vmatpush1.bf16.msra.mxu1 %v1348_v12  ;;  %v1378_v32 = vld [vmem:[%s1960_s1 + $0x100] ss:$8 sps:$4 sm:$0xff]   ;;  %v1382_v33 = vld [vmem:[%s1960_s1 + $0x1f4] ss:$8 sps:$4 sm:$0xff]   ;;  %v1381_v34 = vld [vmem:[%s1960_s1 + $0xf0] ss:$8 sps:$4 sm:$0xff]  }
  0x28   :  { %721 = vmatprep.subr.bf16.mxu1 %v1352_v13  ;;  %v1385_v35 = vld [vmem:[%s1960_s1 + $0xe4] ss:$8 sps:$4 sm:$0xff]   ;;  %v1384_v36 = vld [vmem:[%s1960_s1 + $0x1f0] ss:$8 sps:$4 sm:$0xff]   ;;  %v1387_v38 = vld [vmem:[%s1960_s1 + $0xe0] ss:$8 sps:$4 sm:$0xff]  }
  0x29   :  { %v1388_v37 = vld [vmem:[%s1960_s1 + $0x1e4] ss:$8 sps:$4 sm:$0xff]   ;;  %v1391_v39 = vld [vmem:[%s1960_s1 + $0xd4] ss:$8 sps:$4 sm:$0xff]   ;;  %v1390_v40 = vld [vmem:[%s1960_s1 + $0x1e0] ss:$8 sps:$4 sm:$0xff]  }
  0x2a   :  { %681 = vmatpush1.bf16.msra.mxu0 %v1351_v14  ;;  %v1394_v41 = vld [vmem:[%s1960_s1 + $0x1d4] ss:$8 sps:$4 sm:$0xff]   ;;  %v1393_v42 = vld [vmem:[%s1960_s1 + $0xd0] ss:$8 sps:$4 sm:$0xff]   ;;  %v1397_v43 = vld [vmem:[%s1960_s1 + $0xc4] ss:$8 sps:$4 sm:$0xff]  }
  0x2b   :  { %682 = vmatprep.subr.bf16.mxu0 %v1355_v15  ;;  %722 = vmatpush1.bf16.msra.mxu1 %v1354_v16  ;;  %v1396_v44 = vld [vmem:[%s1960_s1 + $0x1d0] ss:$8 sps:$4 sm:$0xff]   ;;  %v1400_v45 = vld [vmem:[%s1960_s1 + $0x1c4] ss:$8 sps:$4 sm:$0xff]   ;;  %v1399_v47 = vld [vmem:[%s1960_s1 + $0xc0] ss:$8 sps:$4 sm:$0xff]  }
  0x2c   :  { %723 = vmatprep.subr.bf16.mxu1 %v1358_v17  ;;  %v57_v46 = vld [vmem:[%s1959_s0 + $0x8] sm:$0xff]  ;;  %v1403_v49 = vld [vmem:[%s1960_s1 + $0xb4] ss:$8 sps:$4 sm:$0xff]   ;;  %v1405_v54 = vld [vmem:[%s1960_s1 + $0xb0] ss:$8 sps:$4 sm:$0xff]   ;;  %vm670_vm0 = vcmask 130048  }
  0x2d   :  { %v64_v48 = vpack.c.bf16 %v57_v46, %v57_v46  ;;  %v59_v50 = vld [vmem:[%s1959_s0 + $0x18] sm:$0xff]  ;;  %v1402_v51 = vld [vmem:[%s1960_s1 + $0x1c0] ss:$8 sps:$4 sm:$0xff]   ;;  %v1409_v55 = vld [vmem:[%s1960_s1 + $0xa4] ss:$8 sps:$4 sm:$0xff]   ;;  %vm1574_vm1 = vmmov 0  }
  0x2e   :  { %683 = vmatpush1.bf16.msra.mxu0 %v1357_v18  ;;  %v66_v52 = vpack.c.bf16 %v59_v50, %v59_v50  ;;  %v1406_v53 = vld [vmem:[%s1960_s1 + $0x1b4] ss:$8 sps:$4 sm:$0xff]   ;;  %v1408_v56 = vld [vmem:[%s1960_s1 + $0x1b0] ss:$8 sps:$4 sm:$0xff]   ;;  %v1412_v57 = vld [vmem:[%s1960_s1 + $0x1a4] ss:$8 sps:$4 sm:$0xff]  }
  0x2f   :  { %684 = vmatprep.subr.bf16.mxu0 %v1361_v19  ;;  %724 = vmatpush1.bf16.msra.mxu1 %v1360_v20  ;;  %v1411_v58 = vld [vmem:[%s1960_s1 + $0xa0] ss:$8 sps:$4 sm:$0xff]   ;;  %v1415_v59 = vld [vmem:[%s1960_s1 + $0x94] ss:$8 sps:$4 sm:$0xff]   ;;  %v1417_v62 = vld [vmem:[%s1960_s1 + $0x90] ss:$8 sps:$4 sm:$0xff]  }
  0x30   :  { %725 = vmatprep.subr.bf16.mxu1 %v1364_v21  ;;  %706 = vmatprep.mubr.bf16.mxu0 %v64_v48  ;;  %v1414_v60 = vld [vmem:[%s1960_s1 + $0x1a0] ss:$8 sps:$4 sm:$0xff]   ;;  %v1418_v61 = vld [vmem:[%s1960_s1 + $0x194] ss:$8 sps:$4 sm:$0xff]   ;;  %v1421_v63 = vld [vmem:[%s1960_s1 + $0x84] ss:$8 sps:$4 sm:$0xff]  }
  0x31   :  { %747 = vmatprep.mubr.bf16.mxu1 %v66_v52  ;;  %v1420_v0 = vld [vmem:[%s1960_s1 + $0x190] ss:$8 sps:$4 sm:$0xff]   ;;  %v1423_v1 = vld [vmem:[%s1960_s1 + $0x80] ss:$8 sps:$4 sm:$0xff]   ;;  %v1424_v2 = vld [vmem:[%s1960_s1 + $0x184] ss:$8 sps:$4 sm:$0xff]  }
  0x32   :  { %685 = vmatpush1.bf16.msra.mxu0 %v1363_v22  ;;  %v1426_v3 = vld [vmem:[%s1960_s1 + $0x180] ss:$8 sps:$4 sm:$0xff]   ;;  %v1429_v5 = vld [vmem:[%s1960_s1 + $0x274] ss:$8 sps:$4 sm:$0xff]   ;;  %v1427_v8 = vld [vmem:[%s1960_s1 + $0x270] ss:$8 sps:$4 sm:$0xff]  }
  0x33   :  { %686 = vmatprep.subr.bf16.mxu0 %v1367_v23  ;;  %726 = vmatpush1.bf16.msra.mxu1 %v1366_v24  ;;  %v56_v4 = vld [vmem:[%s1959_s0] sm:$0xff]  ;;  %v58_v6 = vld [vmem:[%s1959_s0 + $0x10] sm:$0xff]  ;;  %v61_v16 = vld [vmem:[%s1959_s0 + $0x28] sm:$0xff]  ;;  %v1572_v19 = vmov 0   ;;  %s1575_s24 = smov [#allocation7]  }
  0x34   :  { %727 = vmatprep.subr.bf16.mxu1 %v1370_v25  ;;  %v63_v7 = vpack.c.bf16 %v56_v4, %v56_v4  ;;  %v1432_v9 = vld [vmem:[%s1960_s1 + $0x264] ss:$8 sps:$4 sm:$0xff]   ;;  %v65_v10 = vpack.c.bf16 %v58_v6, %v58_v6  ;;  %v1472_v11 = vld [vmem:[%s1960_s1 + $0x300] ss:$8 sps:$4 sm:$0xff]   ;;  %v1435_v14 = vld [vmem:[%s1960_s1 + $0x254] ss:$8 sps:$4 sm:$0xff]   ;;  %v68_v17 = vpack.c.bf16 %v61_v16, %v61_v16 }
  0x35   :  { %v1474_v12 = vld [vmem:[%s1960_s1 + $0x304] ss:$8 sps:$4 sm:$0xff]   ;;  %v1430_v13 = vld [vmem:[%s1960_s1 + $0x260] ss:$8 sps:$4 sm:$0xff]   ;;  %v62_v15 = vld [vmem:[%s1959_s0 + $0x30] sm:$0xff]  ;;  %s1137_s25 = sshll.u32 %s1575_s24, 4  ;;  %s1138_s25 = int_to_ptr.vmem [resolvable:$true] %s1137_s25 }
  0x36   :  { %687 = vmatpush1.bf16.msra.mxu0 %v1369_v26  ;;  %v1433_v18 = vld [vmem:[%s1960_s1 + $0x250] ss:$8 sps:$4 sm:$0xff]   ;;  %v1438_v20 = vld [vmem:[%s1960_s1 + $0x244] ss:$8 sps:$4 sm:$0xff]   ;;  %v69_v21 = vpack.c.bf16 %v62_v15, %v62_v15  ;;  %v1436_v22 = vld [vmem:[%s1960_s1 + $0x240] ss:$8 sps:$4 sm:$0xff]   ;;  %p1547_p11 = scmp.lt.s32.totalorder %s1138_s25, %s1138_s25 }
  0x37   :  { %688 = vmatprep.subr.bf16.mxu0 %v1373_v27  ;;  %728 = vmatpush1.bf16.msra.mxu1 %v1372_v28  ;;  %v1441_v23 = vld [vmem:[%s1960_s1 + $0x234] ss:$8 sps:$4 sm:$0xff]   ;;  %v1439_v24 = vld [vmem:[%s1960_s1 + $0x230] ss:$8 sps:$4 sm:$0xff]   ;;  %v1444_v25 = vld [vmem:[%s1960_s1 + $0x224] ss:$8 sps:$4 sm:$0xff]  }
  0x38   :  { %729 = vmatprep.subr.bf16.mxu1 %v1376_v29  ;;  %v1442_v26 = vld [vmem:[%s1960_s1 + $0x220] ss:$8 sps:$4 sm:$0xff]   ;;  %v1447_v27 = vld [vmem:[%s1960_s1 + $0x214] ss:$8 sps:$4 sm:$0xff]   ;;  %v1445_v28 = vld [vmem:[%s1960_s1 + $0x210] ss:$8 sps:$4 sm:$0xff]  }
  0x39   :  { %v1450_v29 = vld [vmem:[%s1960_s1 + $0x204] ss:$8 sps:$4 sm:$0xff]   ;;  %v1475_v46 = vld [vmem:[%s1960_s1 + $0x280] ss:$8 sps:$4 sm:$0xff]  }
  0x3a   :  { %689 = vmatpush1.bf16.msra.mxu0 %v1375_v30  ;;  %v1448_v30 = vld [vmem:[%s1960_s1 + $0x200] ss:$8 sps:$4 sm:$0xff]  }
  0x3b   :  { %690 = vmatprep.subr.bf16.mxu0 %v1379_v31  ;;  %730 = vmatpush1.bf16.msra.mxu1 %v1378_v32  ;;  %v1453_v31 = vld [vmem:[%s1960_s1 + $0x2f4] ss:$8 sps:$4 sm:$0xff]   ;;  %v1451_v32 = vld [vmem:[%s1960_s1 + $0x2f0] ss:$8 sps:$4 sm:$0xff]   ;;  %v1479_v50 = vld [vmem:[#allocation2 + $0x38] sm:$0xff]  }
  0x3c   :  { %731 = vmatprep.subr.bf16.mxu1 %v1382_v33  ;;  %v1456_v33 = vld [vmem:[%s1960_s1 + $0x2e4] ss:$8 sps:$4 sm:$0xff]  }
  0x3d   :  { %v1481_v52 = vld [vmem:[#allocation2 + $0x30] sm:$0xff]  }
  0x3e   :  { %691 = vmatpush2.bf16.msra.mxu0 %v1381_v34  ;;  %v1454_v34 = vld [vmem:[%s1960_s1 + $0x2e0] ss:$8 sps:$4 sm:$0xff]  }
  0x3f   :  { %692 = vmatprep.subr.bf16.mxu0 %v1385_v35  ;;  %732 = vmatpush2.bf16.msra.mxu1 %v1384_v36  ;;  %v1459_v35 = vld [vmem:[%s1960_s1 + $0x2d4] ss:$8 sps:$4 sm:$0xff]   ;;  %v1457_v36 = vld [vmem:[%s1960_s1 + $0x2d0] ss:$8 sps:$4 sm:$0xff]  }
  0x40   :  { %733 = vmatprep.subr.bf16.mxu1 %v1388_v37  ;;  %v1462_v37 = vld [vmem:[%s1960_s1 + $0x2c4] ss:$8 sps:$4 sm:$0xff]  }
  0x42   :  { %693 = vmatpush2.bf16.msra.mxu0 %v1387_v38  ;;  %v1460_v38 = vld [vmem:[%s1960_s1 + $0x2c0] ss:$8 sps:$4 sm:$0xff]  }
  0x43   :  { %694 = vmatprep.subr.bf16.mxu0 %v1391_v39  ;;  %734 = vmatpush2.bf16.msra.mxu1 %v1390_v40  ;;  %v1465_v39 = vld [vmem:[%s1960_s1 + $0x2b4] ss:$8 sps:$4 sm:$0xff]   ;;  %v1463_v40 = vld [vmem:[%s1960_s1 + $0x2b0] ss:$8 sps:$4 sm:$0xff]  }
  0x44   :  { %735 = vmatprep.subr.bf16.mxu1 %v1394_v41  ;;  %v1468_v41 = vld [vmem:[%s1960_s1 + $0x2a4] ss:$8 sps:$4 sm:$0xff]  }
  0x46   :  { %695 = vmatpush2.bf16.msra.mxu0 %v1393_v42  ;;  %v1466_v42 = vld [vmem:[%s1960_s1 + $0x2a0] ss:$8 sps:$4 sm:$0xff]  }
  0x47   :  { %696 = vmatprep.subr.bf16.mxu0 %v1397_v43  ;;  %736 = vmatpush2.bf16.msra.mxu1 %v1396_v44  ;;  %v1471_v43 = vld [vmem:[%s1960_s1 + $0x294] ss:$8 sps:$4 sm:$0xff]   ;;  %v1469_v44 = vld [vmem:[%s1960_s1 + $0x290] ss:$8 sps:$4 sm:$0xff]  }
  0x48   :  { %737 = vmatprep.subr.bf16.mxu1 %v1400_v45  ;;  %v1477_v45 = vld [vmem:[%s1960_s1 + $0x284] ss:$8 sps:$4 sm:$0xff]  }
  0x4a   :  { %697 = vmatpush2.bf16.msra.mxu0 %v1399_v47  ;;  %v60_v47 = vld [vmem:[%s1959_s0 + $0x20] sm:$0xff] }
  0x4b   :  { %698 = vmatprep.subr.bf16.mxu0 %v1403_v49  ;;  %738 = vmatpush2.bf16.msra.mxu1 %v1402_v51  ;;  %v67_v48 = vpack.c.bf16 %v60_v47, %v60_v47  ;;  %v1478_v49 = vld [vmem:[#allocation2 + $0x78] sm:$0xff]   ;;  %v1480_v51 = vld [vmem:[#allocation2 + $0x70] sm:$0xff]  }
  0x4c   :  { %739 = vmatprep.subr.bf16.mxu1 %v1406_v53  ;;  %v1482_v53 = vld [vmem:[#allocation2 + $0x68] sm:$0xff]  }
  0x4e   :  { %699 = vmatpush2.bf16.msra.mxu0 %v1405_v54  ;;  %v1483_v54 = vld [vmem:[#allocation2 + $0x28] sm:$0xff]  }
  0x4f   :  { %700 = vmatprep.subr.bf16.mxu0 %v1409_v55  ;;  %740 = vmatpush2.bf16.msra.mxu1 %v1408_v56  ;;  %v1484_v55 = vld [vmem:[#allocation2 + $0x60] sm:$0xff]  }
  0x50   :  { %741 = vmatprep.subr.bf16.mxu1 %v1412_v57  ;;  %v1485_v56 = vld [vmem:[#allocation2 + $0x20] sm:$0xff]   ;;  %v1486_v57 = vld [vmem:[#allocation2 + $0x58] sm:$0xff]  }
  0x52   :  { %701 = vmatpush2.bf16.msra.mxu0 %v1411_v58  ;;  %v1487_v58 = vld [vmem:[#allocation2 + $0x18] sm:$0xff]  }
  0x53   :  { %702 = vmatprep.subr.bf16.mxu0 %v1415_v59  ;;  %742 = vmatpush2.bf16.msra.mxu1 %v1414_v60  ;;  %v1488_v59 = vld [vmem:[#allocation2 + $0x50] sm:$0xff]  }
  0x54   :  { %743 = vmatprep.subr.bf16.mxu1 %v1418_v61  ;;  %v1489_v60 = vld [vmem:[#allocation2 + $0x10] sm:$0xff]   ;;  %v1490_v61 = vld [vmem:[#allocation2 + $0x48] sm:$0xff]  }
  0x56   :  { %703 = vmatpush2.bf16.msra.mxu0 %v1417_v62  ;;  %v1491_v62 = vld [vmem:[#allocation2 + $0x8] sm:$0xff]  }
  0x57   :  { %704 = vmatprep.subr.bf16.mxu0 %v1421_v63  ;;  %744 = vmatpush2.bf16.msra.mxu1 %v1420_v0  ;;  %v1492_v63 = vld [vmem:[#allocation2 + $0x40] sm:$0xff]  }
  0x58   :  { %745 = vmatprep.subr.bf16.mxu1 %v1424_v2  ;;  %v1493_v0 = vld [vmem:[#allocation2] sm:$0xff]  }
  0x5a   :  { %705 = vmatpush2.bf16.msra.mxu0 %v1423_v1  ;;  %v1573_v1 = vmov 0.0  }
  0x5b   :  { %756 = vmatprep.subr.bf16.mxu0 %v1429_v5  ;;  %746 = vmatpush2.bf16.msra.mxu1 %v1426_v3 }
  0x5c   :  { %811 = vmatprep.subr.bf16.mxu1 %v1474_v12 }
  0x5d   :  { %707 = vmatmul.mubr.bf16.vlgmr.msra.gmra.mxu0 %v63_v7 }
  0x5e   :  { %757 = vmatpush1.bf16.msra.mxu0 %v1427_v8  ;;  %748 = vmatmul.mubr.bf16.vlgmr.msra.gmra.mxu1 %v65_v10 }
  0x5f   :  { %758 = vmatprep.subr.bf16.mxu0 %v1432_v9  ;;  %812 = vmatpush1.bf16.msra.mxu1 %v1472_v11 }
  0x60   :  { %829 = vmatprep.mubr.bf16.mxu1 %v1572_v19  ;;  %788 = vmatprep.mubr.bf16.mxu0 %v68_v17  ;;  %v168_v17 = vld [vmem:[%s1961_s2] sm:$0x3] }
  0x61   :  { %1272 = vmatprep.subr.bf16.mxu1 %v1478_v49 }
  0x62   :  { %759 = vmatpush1.bf16.msra.mxu0 %v1430_v13 }
  0x63   :  { %760 = vmatprep.subr.bf16.mxu0 %v1435_v14  ;;  %v170_v14 = vlaneseq }
  0x65   :  { %v171_v15 = vshrl.u32 %v170_v14, 7 }
  0x66   :  { %761 = vmatpush1.bf16.msra.mxu0 %v1433_v18  ;;  %1245 = vmatmul.mubr.msk.bf16.vlgmr.msra.gmra.mxu1 %vm670_vm0, %v69_v21 }
  0x67   :  { %762 = vmatprep.subr.bf16.mxu0 %v1438_v20  ;;  %1273 = vmatpush3.bf16.msra.mxu1 %v1479_v50  ;;  %v172_v16 = vsub.s32 0, %v171_v15  ;;  %v176_v18 = vsub.s32 1, %v171_v15 }
  0x68   :  { %1274 = vmatprep.subr.bf16.mxu1 %v1480_v51 }
  0x69   :  { %v173_v19 = vrot.slane %v168_v17, %v172_v16  ;;  %v177_v20 = vrot.slane %v168_v17, %v176_v18 }
  0x6a   :  { %763 = vmatpush1.bf16.msra.mxu0 %v1436_v22 }
  0x6b   :  { %764 = vmatprep.subr.bf16.mxu0 %v1441_v23  ;;  %1275 = vmatpush3.bf16.msra.mxu1 %v1481_v52 }
  0x6c   :  { %1276 = vmatprep.subr.bf16.mxu1 %v1482_v53 }
  0x6e   :  { %765 = vmatpush1.bf16.msra.mxu0 %v1439_v24 }
  0x6f   :  { %766 = vmatprep.subr.bf16.mxu0 %v1444_v25  ;;  %1277 = vmatpush3.bf16.msra.mxu1 %v1483_v54  ;;  %v1263_v54 = vld [vmem:[%s1965_s6] ss:$0 sm:$0xff] }
  0x70   :  { %1278 = vmatprep.subr.bf16.mxu1 %v1484_v55 }
  0x72   :  { %767 = vmatpush1.bf16.msra.mxu0 %v1442_v26 }
  0x73   :  { %768 = vmatprep.subr.bf16.mxu0 %v1447_v27  ;;  %1279 = vmatpush3.bf16.msra.mxu1 %v1485_v56 }
  0x74   :  { %1280 = vmatprep.subr.bf16.mxu1 %v1486_v57 }
  0x76   :  { %769 = vmatpush1.bf16.msra.mxu0 %v1445_v28 }
  0x77   :  { %770 = vmatprep.subr.bf16.mxu0 %v1450_v29  ;;  %1281 = vmatpush3.bf16.msra.mxu1 %v1487_v58 }
  0x78   :  { %1282 = vmatprep.subr.bf16.mxu1 %v1488_v59 }
  0x7a   :  { %771 = vmatpush1.bf16.msra.mxu0 %v1448_v30 }
  0x7b   :  { %772 = vmatprep.subr.bf16.mxu0 %v1453_v31  ;;  %1283 = vmatpush3.bf16.msra.mxu1 %v1489_v60 }
  0x7c   :  { %1284 = vmatprep.subr.bf16.mxu1 %v1490_v61 }
  0x7e   :  { %773 = vmatpush2.bf16.msra.mxu0 %v1451_v32 }
  0x7f   :  { %774 = vmatprep.subr.bf16.mxu0 %v1456_v33  ;;  %1285 = vmatpush3.bf16.msra.mxu1 %v1491_v62 }
  0x80   :  { %1286 = vmatprep.subr.bf16.mxu1 %v1492_v63 }
  0x82   :  { %775 = vmatpush2.bf16.msra.mxu0 %v1454_v34 }
  0x83   :  { %776 = vmatprep.subr.bf16.mxu0 %v1459_v35  ;;  %1287 = vmatpush3.bf16.msra.mxu1 %v1493_v0 }
  0x84   :  { %1303 = vmatprep.subr.bf16.mxu1 %v1573_v1 }
  0x86   :  { %777 = vmatpush2.bf16.msra.mxu0 %v1457_v36  ;;  %v1494_v36 = vld [vmem:[#allocation5 + $0x38] sm:$0xff]  }
  0x87   :  { %778 = vmatprep.subr.bf16.mxu0 %v1462_v37 }
  0x8a   :  { %779 = vmatpush2.bf16.msra.mxu0 %v1460_v38  ;;  %v1495_v38 = vld [vmem:[#allocation5 + $0x30] sm:$0xff]  }
  0x8b   :  { %780 = vmatprep.subr.bf16.mxu0 %v1465_v39  ;;  %v1496_v39 = vld [vmem:[#allocation5 + $0x28] sm:$0xff]  }
  0x8e   :  { %781 = vmatpush2.bf16.msra.mxu0 %v1463_v40  ;;  %v1497_v40 = vld [vmem:[#allocation5 + $0x20] sm:$0xff]  }
  0x8f   :  { %782 = vmatprep.subr.bf16.mxu0 %v1468_v41  ;;  %v1498_v41 = vld [vmem:[#allocation5 + $0x18] sm:$0xff]  }
  0x92   :  { %783 = vmatpush2.bf16.msra.mxu0 %v1466_v42  ;;  %v1499_v42 = vld [vmem:[#allocation5 + $0x10] sm:$0xff]  }
  0x93   :  { %784 = vmatprep.subr.bf16.mxu0 %v1471_v43  ;;  %v1500_v43 = vld [vmem:[#allocation5 + $0x8] sm:$0xff]  }
  0x96   :  { %785 = vmatpush2.bf16.msra.mxu0 %v1469_v44  ;;  %v1501_v44 = vld [vmem:[#allocation5] sm:$0xff]  }
  0x97   :  { %786 = vmatprep.subr.bf16.mxu0 %v1477_v45 }
  0x9a   :  { %787 = vmatpush2.bf16.msra.mxu0 %v1475_v46  ;;  %v1246_v46 = vld [vmem:[%s1963_s4] ss:$0 sm:$0xff]  ;;  %s1542_s4 = scalar_lea.vmem %s1138_s25, 128 }
  0x9b   :  { %p1543_p10 = scmp.ne.s32.totalorder %s1138_s25, %s1542_s4  ;;  %p1548_p12 = scmp.lt.s32.totalorder %s1542_s4, %s1542_s4 }
  0x9d   :  { %789 = vmatmul.mubr.bf16.vlgmr.msra.gmra.mxu0 %v67_v48  ;;  %p1549_p13 = por %p1548_p12, %p1547_p11 }
  0x9f   :  { %p1550_p0 = pnand %p1549_p13, %p1543_p10 }
 0x11d   :  { %v708_v2 = vpop.f32.mrf.mxu0 }
 0x11e   :  { %v749_v4 = vpop.f32.mrf.mxu1  ;;  %v709_v21 = vadd.f32 %v708_v2, %v173_v19 }
 0x11f   :  { %v710_v3 = vpop.f32.mrf.mxu0 }
 0x120   :  { %v751_v6 = vpop.f32.mrf.mxu1  ;;  %v711_v22 = vadd.f32 %v710_v3, %v177_v20  ;;  %v750_v23 = vadd.f32 %v749_v4, %v709_v21 }
 0x121   :  { %v712_v5 = vpop.f32.mrf.mxu0 }
 0x122   :  { %v753_v8 = vpop.f32.mrf.mxu1  ;;  %v752_v25 = vadd.f32 %v751_v6, %v711_v22 }
 0x123   :  { %v713_v7 = vpop.f32.mrf.mxu0 }
 0x124   :  { %v754_v9 = vpop.f32.mrf.mxu1 }
 0x126   :  { %v831_v10 = vpop.f32.mrf.mxu1 }
 0x128   :  { %v833_v11 = vpop.f32.mrf.mxu1 }
 0x12a   :  { %v835_v12 = vpop.f32.mrf.mxu1 }
 0x12c   :  { %v836_v13 = vpop.f32.mrf.mxu1 }
 0x15d   :  { %v790_v24 = vpop.f32.mrf.mxu0 }
 0x15e   :  { %v791_v26 = vadd.f32 %v790_v24, %v750_v23 }
 0x15f   :  { %v792_v27 = vpop.f32.mrf.mxu0 }
 0x160   :  { %v832_v28 = vadd.f32 %v831_v10, %v791_v26  ;;  %v793_v29 = vadd.f32 %v792_v27, %v752_v25 }
 0x161   :  { %v794_v30 = vpop.f32.mrf.mxu0 }
 0x162   :  { %v834_v31 = vadd.f32 %v833_v11, %v793_v29  ;;  %v838_v32 = vmax.f32 %v832_v28, 0.0 }
 0x163   :  { %v795_v33 = vpop.f32.mrf.mxu0 }
 0x164   :  { %v839_v34 = vmax.f32 %v834_v31, 0.0  ;;  %v840_v37 = vpack.c.bf16 %v838_v32, %v838_v32 }
 0x166   :  { %v841_v35 = vpack.c.bf16 %v839_v34, %v839_v34 }
 0x168   :  { %1009 = vmatprep.mubr.bf16.mxu1 %v841_v35 }
 0x169   :  { %1010 = vmatmul.mubr.bf16.vlgmr.msra.gmra.mxu1 %v840_v37 }
 0x16a   :  { %1304 = vmatpush3.bf16.msra.mxu1 %v1494_v36  ;;  %1319 = vmatprep.mubr.msk.bf16.mxu1 %vm1574_vm1, %v1573_v1 }
 0x16b   :  { %1305 = vmatprep.subr.bf16.mxu1 %v1573_v1 }
 0x16e   :  { %1306 = vmatpush3.bf16.msra.mxu1 %v1495_v38 }
 0x16f   :  { %1307 = vmatprep.subr.bf16.mxu1 %v1573_v1 }
 0x172   :  { %1308 = vmatpush3.bf16.msra.mxu1 %v1496_v39 }
 0x173   :  { %1309 = vmatprep.subr.bf16.mxu1 %v1573_v1 }
 0x176   :  { %1310 = vmatpush3.bf16.msra.mxu1 %v1497_v40 }
 0x177   :  { %1311 = vmatprep.subr.bf16.mxu1 %v1573_v1 }
 0x17a   :  { %1312 = vmatpush3.bf16.msra.mxu1 %v1498_v41 }
 0x17b   :  { %1313 = vmatprep.subr.bf16.mxu1 %v1573_v1 }
 0x17e   :  { %1314 = vmatpush3.bf16.msra.mxu1 %v1499_v42 }
 0x17f   :  { %1315 = vmatprep.subr.bf16.mxu1 %v1573_v1 }
 0x182   :  { %1316 = vmatpush3.bf16.msra.mxu1 %v1500_v43 }
 0x183   :  { %1317 = vmatprep.subr.bf16.mxu1 %v1573_v1 }
 0x186   :  { %1318 = vmatpush3.bf16.msra.mxu1 %v1501_v44 }
 0x229   :  { %v1288_v45 = vpop.f32.mrf.mxu1 }
 0x22b   :  { %v1289_v47 = vpop.f32.mrf.mxu1 }
 0x22c   :  { %v1290_v48 = vadd.f32 %v1289_v47, %v1288_v45 }
 0x22d   :  { %v1291_v49 = vpop.f32.mrf.mxu1 }
 0x22e   :  { %v1012_v50 = vadd.f32 %v1290_v48, %v1246_v46 }
 0x22f   :  { %v1292_v51 = vpop.f32.mrf.mxu1 }
 0x230   :  { %v1017_v52 = vmax.f32 %v1012_v50, 0.0 }
 0x232   :  { %v1018_v53 = vpack.c.bf16 %v1017_v52, %v1017_v52 }
 0x234   :  { %1320 = vmatmul.mubr.bf16.vlgmr.msra.gmra.mxu1 %v1018_v53 }
 0x2f4   :  { %v1124_v55 = vpop.f32.mrf.mxu1 }
 0x2f5   :  { %v1125_v56 = vadd.f32 %v1263_v54, %v1124_v55 }
 0x2f6   :  { %v1321_v57 = vpop.f32.mrf.mxu1 }
 0x2f7   :  { %1130 = vst [vmem:[#allocation7] sm:$0xff] %v1125_v56 }
 0x2f8   :  { %v1127_v58 = vpop.f32.mrf.mxu1 }
 0x2f9   :  { %1553 = shalt.err (!%p1550_p0)
}
 0x2fa   :  { %1140 = dma.vmem_to_hbm [thread:$0]  %s1138_s25, 128, %s1966_s7, [#allocation4]   ;;  %v1322_v59 = vpop.f32.mrf.mxu1 }
 0x2fb   :  { %1566 = dma.done.wait [#allocation4], 128  }
 0x2fc   :  { %1567 = vsyncadd [#allocation4], 4294967168 }
 0x2fd   :  { %1144 = vsyncpa [#allocation3], 1 }
 0x2fe   :  { %1145 = vsyncpa [#allocation6], 1 }
 0x2ff   :  { %1146 = vsyncpa [#allocation4], 1 }

</bundles_post_ra>
